<compile_context>
chip_gen: v7x
topology: tpu7x:2x2x1
jax: 0.10.0
libtpu: 0.0.40
codegen_flags: <defaults>
</compile_context>

<pallas_src>
import jax
import jax.numpy as jnp
import numpy as np
from jax.experimental import pallas as pl
from jax.experimental.pallas import tpu as pltpu


# ----------------------------- Pallas kernel --------------------------------
def spikenet_kernel(x_ref, w_ref, thr_ref, wp_ref, bp_ref, out_ref):
    # x_ref  : (TM, T*2F) bf16  rows laid out [self_t0|neigh_t0 | self_t1|... ]
    # w_ref  : (T*2F, T*H) bf16 block-diagonal copies of stacked [Wr; Wl]
    # thr_ref: (1, T*H)    f32  LIF threshold with SAGE bias folded: 1-(br+bl)
    # wp_ref : (T*H, O)    bf16 pooling weight (unpadded)
    # bp_ref : (1, O)      f32  pooling bias
    # out_ref: (TM, O)     f32  unpadded output tile
    pre = jnp.dot(x_ref[...], w_ref[...],
                  preferred_element_type=jnp.float32)            # (TM, T*H)
    # LIF neuron, tau=1.0: v = pre(+bias); spike = Heaviside(v - 1.0),
    # with the bias folded into the threshold row.
    spike = (pre >= thr_ref[...]).astype(jnp.bfloat16)           # exact 0/1
    acc = jnp.dot(spike, wp_ref[...],
                  preferred_element_type=jnp.float32)            # (TM, O)
    out_ref[...] = acc + bp_ref[...]                             # single store


def spikenet_forward(x_rows, w_blk, thr, wp, bp, *, row_tile=None,
                     vmem_limit_bytes=48 * 1024 * 1024):
    M, K = x_rows.shape
    TH = w_blk.shape[1]
    O = wp.shape[1]

    # Row tile: multiple of 16 (bf16 sublane packing); keep M//TM >= 2 so the
    # "parallel" grid axis can shard across v7x's two TensorCores.  At realistic
    # M, size TM against the per-generation VMEM budget (<=48 MiB on v7x).
    TM = M if row_tile is None else row_tile
    assert M % TM == 0 and TM % 16 == 0

    grid_spec = pltpu.PrefetchScalarGridSpec(
        num_scalar_prefetch=0,
        grid=(M // TM,),                                       # row tiles only
        in_specs=[
            # Contiguous streamed tile.  (Add pipeline_mode=pl.Buffered(3) here
            # if profiling at scale still shows exposed DMA.)
            pl.BlockSpec((TM, K), lambda i: (i, 0)),
            pl.BlockSpec((K, TH), lambda i: (0, 0)),           # resident blockdiag W
            pl.BlockSpec((1, TH), lambda i: (0, 0)),           # threshold row
            pl.BlockSpec((TH, O), lambda i: (0, 0)),           # pooling weight
            pl.BlockSpec((1, O), lambda i: (0, 0)),            # pooling bias
        ],
        out_specs=pl.BlockSpec((TM, O), lambda i: (i, 0)),
    )

    return pl.pallas_call(
        spikenet_kernel,
        out_shape=jax.ShapeDtypeStruct((M, O), jnp.float32),
        grid_spec=grid_spec,
        compiler_params=pltpu.CompilerParams(
            dimension_semantics=("parallel",),                 # megacore on v7x
            vmem_limit_bytes=vmem_limit_bytes),
    )(x_rows, w_blk, thr, wp, bp)


# ------------------------- pure-JAX module reference -------------------------
def spikenet_reference(self_cat, neigh_mean, wr, br, wl, bl, wp, bp):
    """Module-faithful math: per-step self/neigh matmuls, bias add,
    Heaviside at 1.0, temporal concat, pooling Linear.  Operand dtypes follow
    whatever the caller passes (f32 for the exact reference, bf16 to mirror the
    kernel's operand precision)."""
    T = self_cat.shape[0]
    spikes = []
    for t in range(T):
        pre = (jnp.dot(self_cat[t], wr, preferred_element_type=jnp.float32) + br
               + jnp.dot(neigh_mean[t], wl, preferred_element_type=jnp.float32) + bl)
        spikes.append((pre >= 1.0).astype(jnp.float32))
    sp = jnp.concatenate(spikes, axis=1)                     # (M, T*H)
    return jnp.dot(sp.astype(wp.dtype), wp,
                   preferred_element_type=jnp.float32) + bp


# --------------------------------- main --------------------------------------
if __name__ == "__main__":
    # small, forward-consistent sizes
    T = 3                     # len(data): number of temporal graph snapshots
    V = 64                    # total nodes per snapshot
    F = 16                    # in_features
    H = 32                    # hids=[32]
    O = 8                     # out_features
    N = 8                     # batch of seed nodes
    SIZES = [5, 2]            # neighbor fan-out per hop
    S0, S1 = SIZES
    M = N + N * S0            # rows in the layer output (6N = 48)

    keys = jax.random.split(jax.random.PRNGKey(0), 10)

    # snapshot node features, seed nodes, and precomputed sampled neighbor ids
    X = jax.random.normal(keys[0], (T, V, F), jnp.float32)
    nodes = jax.random.randint(keys[1], (N,), 0, V)
    # TODO(synk): Sampler/RandomWalkSampler graph sampling is data-dependent
    # host-side random index generation with no Pallas equivalent; neighbor
    # index tables are drawn deterministically here.
    nbr1 = jax.random.randint(keys[2], (T, N * S0), 0, V)            # hop-1 ids
    nbr2 = jax.random.randint(keys[3], (T, N * S0 * S1), 0, V)       # hop-2 ids

    # gather features (host/XLA glue)
    tidx = jnp.arange(T)[:, None]
    h0 = jnp.take(X, nodes, axis=1)               # (T, N, F)
    h1 = X[tidx, nbr1]                            # (T, 5N, F)
    h2 = X[tidx, nbr2]                            # (T, 10N, F)

    self_cat = jnp.concatenate([h0, h1], axis=1)                      # (T, M, F)
    nmean0 = h1.reshape(T, N, S0, F).mean(axis=2)                     # (T, N, F)
    nmean1 = h2.reshape(T, N * S0, S1, F).mean(axis=2)                # (T, 5N, F)
    neigh_mean = jnp.concatenate([nmean0, nmean1], axis=1)            # (T, M, F)

    # deterministic parameter init (nn.Linear equivalents, stored as (in, out))
    wr = 0.5 * jax.random.normal(keys[4], (F, H), jnp.float32)   # SAGE self weight
    wl = 0.5 * jax.random.normal(keys[5], (F, H), jnp.float32)   # SAGE neigh weight
    br = 0.1 * jax.random.normal(keys[6], (1, H), jnp.float32)
    bl = 0.1 * jax.random.normal(keys[7], (1, H), jnp.float32)
    wp = 0.2 * jax.random.normal(keys[8], (T * H, O), jnp.float32)   # pooling
    bp = 0.1 * jax.random.normal(keys[9], (1, O), jnp.float32)

    # ---------- kernel-side layout / precision transforms (wrapper glue) ------
    # (M, T*2F) row-major bf16 slab: per-row chunks [self_t, mean_neigh_t] for
    # t = 0..T-1 -> one contiguous DMA per row tile.
    x_fused = jnp.concatenate([self_cat, neigh_mean], axis=-1)        # (T, M, 2F)
    x_rows = jnp.transpose(x_fused, (1, 0, 2)).reshape(M, T * 2 * F)
    x_rows = x_rows.astype(jnp.bfloat16)                              # (M, T*2F)

    # block-diagonal stacked SAGE weight: T copies of [Wr; Wl] on the diagonal
    w_stack = jnp.concatenate([wr, wl], axis=0)                       # (2F, H)
    w_blk = jnp.kron(jnp.eye(T, dtype=jnp.float32),
                     w_stack).astype(jnp.bfloat16)                    # (T*2F, T*H)
    # LIF threshold with the SAGE bias folded in (per time-step tile)
    thr = jnp.tile(1.0 - (br + bl), (1, T))                           # (1, T*H) f32
    wp_bf = wp.astype(jnp.bfloat16)                                   # (T*H, O)

    out = spikenet_forward(x_rows, w_blk, thr, wp_bf, bp, row_tile=16)
    out = jax.block_until_ready(out)
    assert out.shape == (M, O)

    # Check 1: reference with the same bf16 operand precision as the kernel
    # (validates layout / blockdiag fusion / threshold fold exactly).
    ref_bf = spikenet_reference(self_cat.astype(jnp.bfloat16),
                                neigh_mean.astype(jnp.bfloat16),
                                wr.astype(jnp.bfloat16), br,
                                wl.astype(jnp.bfloat16), bl,
                                wp_bf, bp)
    np.testing.assert_allclose(np.asarray(out), np.asarray(ref_bf),
                               rtol=1e-3, atol=1e-3)

    # Check 2: full-f32 module reference, compared only on rows whose
    # pre-activations stay safely away from the Heaviside threshold (bf16
    # operands can flip spikes inside a narrow band around v_th = 1.0).
    pre_f32 = (jnp.einsum('tmf,fh->tmh', self_cat, wr,
                          precision=jax.lax.Precision.HIGHEST) + br
               + jnp.einsum('tmf,fh->tmh', neigh_mean, wl,
                            precision=jax.lax.Precision.HIGHEST) + bl)
    safe = np.asarray((jnp.abs(pre_f32 - 1.0) > 0.1).all(axis=(0, 2)))
    ref_f32 = spikenet_reference(self_cat, neigh_mean, wr, br, wl, bl, wp, bp)
    if safe.any():
        np.testing.assert_allclose(np.asarray(out)[safe],
                                   np.asarray(ref_f32)[safe],
                                   rtol=2e-2, atol=2e-2)

    print("KERNEL_OK")
</pallas_src>

<mosaic_0001>
module attributes {stable_mosaic.version = 11 : i64} {
  func.func @spikenet_kernel(%arg0: i32, %arg1: memref<16x96xbf16, #tpu.memory_space<vmem>>, %arg2: memref<96x96xbf16, #tpu.memory_space<vmem>>, %arg3: memref<1x96xf32, #tpu.memory_space<vmem>>, %arg4: memref<96x8xbf16, #tpu.memory_space<vmem>>, %arg5: memref<1x8xf32, #tpu.memory_space<vmem>>, %arg6: memref<16x8xf32, #tpu.memory_space<vmem>>) attributes {dimension_semantics = [#tpu.dimension_semantics<parallel>], iteration_bounds = array<i64: 3>, scalar_prefetch = 0 : i64, scratch_operands = 0 : i64, tpu.core_type = #tpu.core_type<tc>, window_params = [{transform_indices = @transform_0, window_bounds = array<i64: 16, 96>}, {pipeline_mode = #tpu.pipeline_mode<synchronous>, transform_indices = @transform_1, window_bounds = array<i64: 96, 96>}, {pipeline_mode = #tpu.pipeline_mode<synchronous>, transform_indices = @transform_2, window_bounds = array<i64: 1, 96>}, {pipeline_mode = #tpu.pipeline_mode<synchronous>, transform_indices = @transform_3, window_bounds = array<i64: 96, 8>}, {pipeline_mode = #tpu.pipeline_mode<synchronous>, transform_indices = @transform_4, window_bounds = array<i64: 1, 8>}, {transform_indices = @transform_5, window_bounds = array<i64: 16, 8>}]} {
    %c0 = arith.constant 0 : index
    %c0_0 = arith.constant 0 : index
    %0 = vector.load %arg1[%c0, %c0_0] : memref<16x96xbf16, #tpu.memory_space<vmem>>, vector<16x96xbf16>
    %c0_1 = arith.constant 0 : index
    %c0_2 = arith.constant 0 : index
    %1 = vector.load %arg2[%c0_1, %c0_2] : memref<96x96xbf16, #tpu.memory_space<vmem>>, vector<96x96xbf16>
    %cst = arith.constant dense<0.000000e+00> : vector<16x96xf32>
    %2 = tpu.matmul %0, %1, %cst {dimension_numbers = #tpu.dot_dimension_numbers<[1], [0], [0], [1], [0, 0, 1, 1], [], []>} : vector<16x96xbf16>, vector<96x96xbf16>, vector<16x96xf32> -> vector<16x96xf32>
    %c0_3 = arith.constant 0 : index
    %c0_4 = arith.constant 0 : index
    %3 = vector.load %arg3[%c0_3, %c0_4] : memref<1x96xf32, #tpu.memory_space<vmem>>, vector<1x96xf32>
    %4 = vector.broadcast %3 : vector<1x96xf32> to vector<16x96xf32>
    %5 = arith.cmpf oge, %2, %4 : vector<16x96xf32>
    %6 = arith.extui %5 : vector<16x96xi1> to vector<16x96xi32>
    %7 = arith.sitofp %6 : vector<16x96xi32> to vector<16x96xf32>
    %8 = arith.truncf %7 : vector<16x96xf32> to vector<16x96xbf16>
    %c0_5 = arith.constant 0 : index
    %c0_6 = arith.constant 0 : index
    %9 = vector.load %arg4[%c0_5, %c0_6] : memref<96x8xbf16, #tpu.memory_space<vmem>>, vector<96x8xbf16>
    %cst_7 = arith.constant dense<0.000000e+00> : vector<16x8xf32>
    %10 = tpu.matmul %8, %9, %cst_7 {dimension_numbers = #tpu.dot_dimension_numbers<[1], [0], [0], [1], [0, 0, 1, 1], [], []>} : vector<16x96xbf16>, vector<96x8xbf16>, vector<16x8xf32> -> vector<16x8xf32>
    %c0_8 = arith.constant 0 : index
    %c0_9 = arith.constant 0 : index
    %11 = vector.load %arg5[%c0_8, %c0_9] : memref<1x8xf32, #tpu.memory_space<vmem>>, vector<1x8xf32>
    %12 = vector.broadcast %11 : vector<1x8xf32> to vector<16x8xf32>
    %13 = arith.addf %10, %12 : vector<16x8xf32>
    %c0_10 = arith.constant 0 : index
    %c0_11 = arith.constant 0 : index
    %14 = vector.load %arg6[%c0_10, %c0_11] : memref<16x8xf32, #tpu.memory_space<vmem>>, vector<16x8xf32>
    tpu.vector_store %arg6[%c0_10, %c0_11], %13 {strides = array<i32>} : memref<16x8xf32, #tpu.memory_space<vmem>>, vector<16x8xf32>,
    return
  }
  func.func @transform_0(%arg0: i32) -> (i32, i32) {
    %c0_i32 = arith.constant 0 : i32
    %c0_i32_0 = arith.constant 0 : i32
    return %arg0, %c0_i32 : i32, i32
  }
  func.func @transform_1(%arg0: i32) -> (i32, i32) {
    %c0_i32 = arith.constant 0 : i32
    %c0_i32_0 = arith.constant 0 : i32
    %c0_i32_1 = arith.constant 0 : i32
    return %c0_i32, %c0_i32_0 : i32, i32
  }
  func.func @transform_2(%arg0: i32) -> (i32, i32) {
    %c0_i32 = arith.constant 0 : i32
    %c0_i32_0 = arith.constant 0 : i32
    %c0_i32_1 = arith.constant 0 : i32
    return %c0_i32, %c0_i32_0 : i32, i32
  }
  func.func @transform_3(%arg0: i32) -> (i32, i32) {
    %c0_i32 = arith.constant 0 : i32
    %c0_i32_0 = arith.constant 0 : i32
    %c0_i32_1 = arith.constant 0 : i32
    return %c0_i32, %c0_i32_0 : i32, i32
  }
  func.func @transform_4(%arg0: i32) -> (i32, i32) {
    %c0_i32 = arith.constant 0 : i32
    %c0_i32_0 = arith.constant 0 : i32
    %c0_i32_1 = arith.constant 0 : i32
    return %c0_i32, %c0_i32_0 : i32, i32
  }
  func.func @transform_5(%arg0: i32) -> (i32, i32) {
    %c0_i32 = arith.constant 0 : i32
    %c0_i32_0 = arith.constant 0 : i32
    return %arg0, %c0_i32 : i32, i32
  }
}

</mosaic_0001>

<bundles_post_ra>
// kernel: tpu_custom_call.1
= control target key start
LH: loop header
LB: loop body
LE: loop exit
PB: predicated region body
PF: predicated region fallthrough
CT: control target
= control target key end

     0   :  { %10 = vsyncpa [#allocation3], 0  ;;  %s923_s0 = inlined_call_operand.hbm [shape: bf16[48,96], index: 0, kind: input, shape index: {}]   ;;  %s924_s1 = inlined_call_operand.vmem [shape: bf16[96,96], index: 1, kind: input, shape index: {}]   ;;  %s925_s2 = inlined_call_operand.vmem [shape: f32[1,96], index: 2, kind: input, shape index: {}]   ;;  %s926_s3 = inlined_call_operand.vmem [shape: bf16[96,8], index: 3, kind: input, shape index: {}]   ;;  %s927_s4 = inlined_call_operand.vmem [shape: f32[1,8], index: 4, kind: input, shape index: {}]   ;;  %s928_s5 = inlined_call_operand.vmem [shape: f32[48,8], index: 5, kind: output, shape index: {}]  }
   0x1   :  { %12 = vsyncpa [#allocation3 + $0x1], 0  ;;  %s767_s18 = smov 0   ;;  %s769_s19 = smov 0  }
   0x2   :  { %s771_s20 = smov 0   ;;  %s773_s21 = smov 0  }
   0x3 LB: > { %s531_s22 = sadd.s32 4294967295, %s730_s21   ;;  %s787_s23 = sadd.s32 1, %s730_s21   ;;  %s730_s21 = sphi %s773_s21, %s935_s21   ;;  %s726_s20 = sphi %s771_s20, %s934_s20   ;;  %s722_s19 = sphi %s769_s19, %s933_s19   ;;  %s718_s18 = sphi %s767_s18, %s932_s18  }
   0x4   : > { %s22_s24 = ssub.s32 %s730_s21, %s787_s23  ;;  %s25_s25 = sadd.s32 1, %s726_s20 }
   0x5   : > { %p23_p0 = scmp.eq.s32.totalorder %s22_s24, 0  ;;  %p32_p1 = scmp.ne.s32.totalorder %s726_s20, %s722_s19 }
   0x6   : > { %p33_p2 = scmp.eq.s32.totalorder %s730_s21, 0  ;;  %p38_p3 = scmp.ne.s32.totalorder %s722_s19, %s718_s18 }
   0x7   : > { %s797_s26 = scalar_select %p23_p0, %s726_s20, %s25_s25  }
   0x8   : > { %p34_p4 = por %p33_p2, %p32_p1  ;;  %p39_p5 = scmp.eq.s32.totalorder %s531_s22, 0 }
   0x9   : > { %p616_p6 = scmp.lt.s32.totalorder %s730_s21, 3  ;;  %s184_s28 = sand.u32 1, %s726_s20  }
   0xa   : > { %p802_p7 = por %p39_p5, %p38_p3  ;;  %s535_s29 = sshll.u32 %s184_s28, 3 }
   0xb   : > { %s563_s30 = sshll.u32 %s730_s21, 7  ;;  %s188_s9 = scalar_lea.vmem [#allocation2], %s535_s29 }
   0xc   : > { %s811_s8 = scalar_lea.hbm %s923_s0, %s563_s30  ;;  %s195_s10 = sshll.u32 %s188_s9, 4  ;;  %s813_s10 = int_to_ptr.vmem [resolvable:$true] %s195_s10 }
   0xd   : > { %p815_p8 = pnand %p616_p6, %p34_p4  ;;  %s820_s12 = scalar_lea.sflag [#allocation3], %s184_s28 }
   0xe   : > { %s666_s13 = scalar_lea.hbm %s811_s8, 128  ;;  %s671_s16 = scalar_lea.hbm %s923_s0, 384 }
   0xf   : > { %p667_p10 = scmp.ne.s32.totalorder %s811_s8, %s666_s13  ;;  %p668_p11 = pneg %p815_p8 }
  0x10   : > { %p672_p0 = scmp.lt.u32.totalorder %s811_s8, %s923_s0  ;;  %p673_p1 = scmp.lt.u32.totalorder %s671_s16, %s666_s13 }
  0x11   : > { %p669_p12 = pnand %p668_p11, %p667_p10  ;;  %p675_p3 = scmp.lt.u32.totalorder %s666_s13, %s811_s8 }
  0x12   : > { %p674_p2 = por %p673_p1, %p672_p0 }
  0x13   : > { %p670_p13 = pneg %p669_p12 }
  0x14   : > { %p676_p4 = por %p675_p3, %p674_p2 }
  0x16   : > { %p677_p5 = pnand %p676_p4, %p670_p13 }
  0x18   : > { %680 = shalt.err (!%p677_p5)
}
  0x19   : > { %s681_s24 = scalar_lea.vmem %s813_s10, 128  ;;  %s732_s25 = smov [#allocation2]  }
  0x1a   : > { %p682_p6 = scmp.ne.s32.totalorder %s813_s10, %s681_s24  ;;  %s686_s28 = sshll.u32 %s732_s25, 4  ;;  %s687_s28 = int_to_ptr.vmem [resolvable:$false] %s686_s28 }
  0x1b   : > { %s688_s29 = scalar_lea.vmem %s687_s28, 256  ;;  %p689_p9 = scmp.lt.s32.totalorder %s813_s10, %s687_s28 }
  0x1c   : > { %p684_p10 = pnand %p682_p6, %p668_p11  ;;  %p690_p0 = scmp.lt.s32.totalorder %s688_s29, %s681_s24 }
  0x1e   : > { %p685_p12 = pneg %p684_p10  ;;  %p691_p1 = por %p690_p0, %p689_p9 }
  0x20   : > { %p692_p2 = pnand %p691_p1, %p685_p12 }
  0x22   : > { %695 = shalt.err (!%p692_p2)
}
  0x23   : > { %s733_s30 = smov 64   ;;  %s734_s6 = smov 4  }
  0x24   : > { %615 = dma.hbm_to_vmem [thread:$0]  (!%p815_p8), %s811_s8, 128, %s813_s10, %s820_s12, %s733_s30, %s733_s30, %s734_s6  }
  0x25   : > { %p203_p11 = scmp.lt.s32.totalorder %s730_s21, 4  ;;  %p931_p13 = scmp.ge.s32.totalorder %s730_s21, 1 }
  0x27   : > { %p204_p3 = pnand %p931_p13, %p203_p11 }
  0x28   : > { %s209_s7 = sand.u32 (!%p204_p3), 1, %s722_s19  }
  0x29   : > { %207 = sbr.rel (%p204_p3) target bundleno = 510 (0x1fe), region = 40  ;;  %s852_s9 = sshll.u32 (!%p204_p3), %s209_s7, 3 }
  0x2a   : > { %s210_s13 = scalar_lea.sflag (!%p204_p3), [#allocation3], %s209_s7  ;;  %s213_s14 = scalar_lea.vmem (!%p204_p3), [#allocation2], %s852_s9 }
  0x30   : > { %713 = dma.done.wait (%p802_p7), %s210_s13, 128  }
  0x31   : > { %715 = vsyncadd (%p802_p7), %s210_s13, 4294967168  ;;  %v735_v0 = vmov 0.0   ;;  %vm736_vm0 = vmmov 0   ;;  %v653_v1 = vld [vmem:[%s924_s1] sm:$0xff]   ;;  %v654_v2 = vld [vmem:[%s924_s1 + $0x8] sm:$0xff]   ;;  %vm303_vm1 = vcmask 785408  }
  0x32   : > { %578 = vmatprep.subr.bf16.mxu0 %v735_v0  ;;  %590 = vmatprep.mubr.msk.bf16.mxu0 %vm736_vm0, %v735_v0  ;;  %v655_v3 = vld [vmem:[%s924_s1 + $0x10] sm:$0xff]   ;;  %v660_v4 = vld [vmem:[%s926_s3] sm:$0xff]   ;;  %v661_v5 = vld [vmem:[%s926_s3 + $0x8] sm:$0xff]   ;;  %s540_s17 = sshll.u32 %s531_s22, 1  ;;  %vm461_vm4 = vcmask 64512  }
  0x33   : > { %594 = vmatprep.subr.bf16.mxu1 %v735_v0  ;;  %606 = vmatprep.mubr.msk.bf16.mxu1 %vm736_vm0, %v735_v0  ;;  %v656_v6 = vld [vmem:[%s924_s1 + $0x18] sm:$0xff]   ;;  %v662_v7 = vld [vmem:[%s926_s3 + $0x10] sm:$0xff]   ;;  %v657_v8 = vld [vmem:[%s924_s1 + $0x20] sm:$0xff]   ;;  %p242_p7 = scmp.lt.s32.totalorder %s540_s17, 5 }
  0x34   : > { %579 = vmatpush3.bf16.msra.mxu0 %v653_v1  ;;  %595 = vmatpush3.bf16.msra.mxu1 %v660_v4  ;;  %v663_v9 = vld [vmem:[%s926_s3 + $0x18] sm:$0xff]   ;;  %v658_v10 = vld [vmem:[%s924_s1 + $0x28] sm:$0xff]   ;;  %v664_v12 = vld [vmem:[%s926_s3 + $0x20] sm:$0xff]  }
  0x35   : > { %580 = vmatprep.subr.bf16.mxu0 %v735_v0  ;;  %596 = vmatprep.subr.bf16.mxu1 %v735_v0  ;;  %v659_v11 = vld [vmem:[%s213_s14] sm:$0xff]   ;;  %s937_s17 = smov (!%p242_p7, %s540_s17), 5 }
  0x36   : > { %v665_v13 = vld [vmem:[%s926_s3 + $0x28] sm:$0xff]   ;;  %v550_v14 = vld [vmem:[%s925_s2] ss:$0 sm:$0xff]  ;;  %s541_s18 = sshll.u32 %s937_s17, 3 }
  0x37   : > { %v553_v22 = vld [vmem:[%s927_s4] ss:$0 sm:$0xff]  ;;  %s245_s30 = scalar_lea.vmem %s928_s5, %s541_s18 }
  0x38   : > { %581 = vmatpush3.bf16.msra.mxu0 %v654_v2  ;;  %597 = vmatpush3.bf16.msra.mxu1 %v661_v5 }
  0x39   : > { %582 = vmatprep.subr.bf16.mxu0 %v735_v0  ;;  %598 = vmatprep.subr.bf16.mxu1 %v735_v0 }
  0x3c   : > { %583 = vmatpush3.bf16.msra.mxu0 %v655_v3  ;;  %599 = vmatpush3.bf16.msra.mxu1 %v662_v7 }
  0x3d   : > { %584 = vmatprep.subr.bf16.mxu0 %v735_v0  ;;  %600 = vmatprep.subr.bf16.mxu1 %v735_v0 }
  0x40   : > { %585 = vmatpush3.bf16.msra.mxu0 %v656_v6  ;;  %601 = vmatpush3.bf16.msra.mxu1 %v663_v9 }
  0x41   : > { %586 = vmatprep.subr.bf16.mxu0 %v735_v0  ;;  %602 = vmatprep.subr.bf16.mxu1 %v735_v0 }
  0x44   : > { %587 = vmatpush3.bf16.msra.mxu0 %v657_v8  ;;  %603 = vmatpush3.bf16.msra.mxu1 %v664_v12 }
  0x45   : > { %588 = vmatprep.subr.bf16.mxu0 %v735_v0  ;;  %604 = vmatprep.subr.bf16.mxu1 %v735_v0 }
  0x48   : > { %589 = vmatpush3.bf16.msra.mxu0 %v658_v10  ;;  %605 = vmatpush3.bf16.msra.mxu1 %v665_v13 }
  0x4b   : > { %591 = vmatmul.mubr.msk.bf16.vlgmr.msra.gmra.mrb[0].mxu0 %vm303_vm1, %v659_v11 }
 0x11e   : > { %v341_v15 = vpop.f32.mrb[0].mxu0 }
 0x11f   : > { %vm355_vm2 = vcmp.ge.f32.partialorder %v341_v15, %v550_v14  ;;  %v592_v16 = vpop.f32.mrb[1].mxu0 }
 0x120   : > { %v344_v17 = vpop.f32.mrb[2].mxu0  ;;  %v551_v19 = vsel %vm355_vm2, 1.0, %v735_v0 }
 0x121   : > { %vm356_vm3 = vcmp.ge.f32.partialorder %v344_v17, %v550_v14  ;;  %v593_v18 = vpop.f32.mrb[3].mxu0 }
 0x122   : > { %v552_v20 = vsel %vm356_vm3, 1.0, %v735_v0 }
 0x123   : > { %v361_v21 = vpack.c.bf16 %v552_v20, %v551_v19 }
 0x125   : > { %607 = vmatmul.mubr.msk.bf16.vlgmr.msra.gmra.mrb[0].mxu1 %vm303_vm1, %v361_v21 }
 0x1f8   : > { %v454_v23 = vpop.f32.mrb[0].mxu1 }
 0x1f9   : > { %v455_v24 = vadd.f32 %v553_v22, %v454_v23  ;;  %v608_v25 = vpop.f32.mrb[1].mxu1 }
 0x1fa   : > { %v457_v26 = vpop.f32.mrb[2].mxu1 }
 0x1fb   : > { %462 = vst.msk [vmem:[%s245_s30] sm:$0xff] %vm461_vm4, %v455_v24  ;;  %v458_v27 = vadd.f32 %v553_v22, %v457_v26  ;;  %v609_v28 = vpop.f32.mrb[3].mxu1 }
 0x1fd   : > { %463 = vst.msk [vmem:[%s245_s30 + $0x8] sm:$0xff] %vm461_vm4, %v458_v27 }
 0x1fe PF: > { %p15_p8 = scmp.ge.s32.totalorder %s787_s23, 5   ;;  %s932_s18 = smov %s722_s19 }
 0x1ff   : > { %s933_s19 = smov %s726_s20  ;;  %s934_s20 = smov %s797_s26 }
 0x200   : > { %s935_s21 = smov %s787_s23  ;;  %17 = sbr.rel (!%p15_p8) target bundleno = 3 (0x3), region = 80 }
 0x207   :  { %486 = vsyncpa [#allocation3], 1 }
 0x208   :  { %488 = vsyncpa [#allocation3 + $0x1], 1 }

</bundles_post_ra>
